<compile_context>
chip_gen: v5e
topology: v5e:2x2
jax: 0.10.0
libtpu: 0.0.40
codegen_flags: <defaults>
</compile_context>

<pallas_src>
import jax
import jax.numpy as jnp
from jax.experimental import pallas as pl
from jax.experimental.pallas import tpu as pltpu


def _round_up(x, m):
    return ((x + m - 1) // m) * m


def _cdiv(a, b):
    return -(-a // b)


def _conv_matmul_kernel(pT_ref, w_ref, b_ref, o_ref):
    # pT_ref: (K, TM)  im2col patches for one image, transposed (lane-dense TM)
    # w_ref : (OC, K)  weight, VMEM-resident across the grid
    # b_ref : (OC, 1)  bias, VMEM-resident across the grid
    # o_ref : (OC, TM) output tile, lane-dense along TM
    acc = jnp.dot(w_ref[...], pT_ref[...], preferred_element_type=jnp.float32)
    o_ref[...] = (acc + b_ref[...]).astype(o_ref.dtype)


def conv2d_k4_s4(x, weight, bias, *, k=4, s=4, tm=8192):
    """x: (B, C, H, W) NCHW; weight: (OC, C, k, k); bias: (OC,).
    Returns (B, OC, H//s, W//s), matching torch.nn.Conv2d(kernel_size=4, stride=4)."""
    B, C, H, W = x.shape
    OC = weight.shape[0]
    assert H % s == 0 and W % s == 0 and k == s, "non-overlapping patches assumed"
    Ho, Wo = H // s, W // s

    Mb = Ho * Wo           # output pixels per image
    K = C * k * k          # contraction size, ordered (c, kh, kw)
    N = OC

    # Large lane-dense M tile (multiple of 128) to amortize per-step overhead,
    # clamped so the fully-parallel grid has >= 2 steps total (v7x megacore).
    TM = min(tm, _round_up(Mb, 128))
    if B * _cdiv(Mb, TM) < 2 and Mb > 128:
        TM = _round_up(_cdiv(Mb, 2), 128)
    Mb_pad = _round_up(Mb, TM)

    # Transposed im2col, batch-major: (B, K, Mb) with K ordered (c, kh, kw)
    # and Mb ordered (ho, wo). Pure layout; allow_input_fusion below lets XLA
    # fold it (and the zero pad) into the pallas custom call.
    # TODO(synk): if an HLO/xprof dump shows this 6-D transpose still
    # materializing in HBM, move the im2col on-chip (natural-layout x
    # BlockSpec + in-kernel reshapes) instead of relying on fusion.
    patches_T = x.reshape(B, C, Ho, k, Wo, k).transpose(0, 1, 3, 5, 2, 4)
    patches_T = patches_T.reshape(B, K, Mb)
    if Mb_pad != Mb:
        patches_T = jnp.pad(patches_T, ((0, 0), (0, 0), (0, Mb_pad - Mb)))

    w_mat = weight.reshape(OC, K)   # (OC, K); K order (c, kh, kw) matches patches
    b_mat = bias.reshape(OC, 1)     # broadcasts over the M tile inside the kernel

    grid = (B, Mb_pad // TM)

    out = pl.pallas_call(
        _conv_matmul_kernel,
        out_shape=jax.ShapeDtypeStruct((B, N, Mb_pad), x.dtype),
        grid_spec=pl.GridSpec(
            grid=grid,
            in_specs=[
                # patches: batch dim squeezed, tiled over the pixel axis
                pl.BlockSpec((None, K, TM), lambda b, m: (b, 0, m)),
                pl.BlockSpec((N, K), lambda b, m: (0, 0)),   # weight: resident
                pl.BlockSpec((N, 1), lambda b, m: (0, 0)),   # bias:   resident
            ],
            out_specs=pl.BlockSpec((None, N, TM), lambda b, m: (b, 0, m)),
        ),
        compiler_params=pltpu.CompilerParams(
            dimension_semantics=("parallel", "parallel"),   # megacore shards B/M
            allow_input_fusion=[True, False, False],        # fold im2col in
        ),
        cost_estimate=pl.CostEstimate(
            flops=2 * B * Mb_pad * K * N,
            transcendentals=0,
            bytes_accessed=4 * (B * Mb_pad * K + K * N + B * Mb_pad * N),
        ),
    )(patches_T, w_mat, b_mat)

    # (B, OC, Mb_pad) -> drop pad -> (B, OC, Ho, Wo): reshape only, no transpose.
    return out[:, :, :Mb].reshape(B, OC, Ho, Wo)


if __name__ == "__main__":
    key = jax.random.PRNGKey(0)
    kx, kw, kb = jax.random.split(key, 3)

    B, C, H, W = 2, 3, 16, 16
    OC, k = 96, 4

    x = jax.random.normal(kx, (B, C, H, W), dtype=jnp.float32)
    # deterministic param init (synthetic; mirrors nn.Conv2d shapes)
    fan_in = C * k * k
    bound = 1.0 / (fan_in ** 0.5)
    weight = jax.random.uniform(kw, (OC, C, k, k), jnp.float32, -bound, bound)
    bias = jax.random.uniform(kb, (OC,), jnp.float32, -bound, bound)

    y = jax.jit(conv2d_k4_s4)(x, weight, bias)
    jax.block_until_ready(y)

    # sanity check against XLA's conv (reference semantics of nn.Conv2d)
    y_ref = jax.lax.conv_general_dilated(
        x, weight, window_strides=(4, 4), padding="VALID",
        dimension_numbers=("NCHW", "OIHW", "NCHW"),
    ) + bias.reshape(1, OC, 1, 1)
    assert y.shape == (B, OC, H // 4, W // 4)
    assert jnp.allclose(y, y_ref, atol=1e-5, rtol=1e-5)

    print("KERNEL_OK")
</pallas_src>

<mosaic_0001>
module attributes {stable_mosaic.version = 11 : i64} {
  func.func @_conv_matmul_kernel(%arg0: i32, %arg1: i32, %arg2: memref<1x48x128xf32, #tpu.memory_space<vmem>>, %arg3: memref<96x48xf32, #tpu.memory_space<vmem>>, %arg4: memref<96x1xf32, #tpu.memory_space<vmem>>, %arg5: memref<1x96x128xf32, #tpu.memory_space<vmem>>) attributes {dimension_semantics = [#tpu.dimension_semantics<parallel>, #tpu.dimension_semantics<parallel>], iteration_bounds = array<i64: 2, 1>, scalar_prefetch = 0 : i64, scratch_operands = 0 : i64, tpu.core_type = #tpu.core_type<tc>, window_params = [{transform_indices = @transform_0, window_bounds = array<i64: 1, 48, 128>}, {pipeline_mode = #tpu.pipeline_mode<synchronous>, transform_indices = @transform_1, window_bounds = array<i64: 96, 48>}, {pipeline_mode = #tpu.pipeline_mode<synchronous>, transform_indices = @transform_2, window_bounds = array<i64: 96, 1>}, {transform_indices = @transform_3, window_bounds = array<i64: 1, 96, 128>}]} {
    %c0 = arith.constant 0 : index
    %c0_0 = arith.constant 0 : index
    %0 = vector.load %arg3[%c0, %c0_0] : memref<96x48xf32, #tpu.memory_space<vmem>>, vector<96x48xf32>
    %c0_1 = arith.constant 0 : index
    %c0_2 = arith.constant 0 : index
    %c0_3 = arith.constant 0 : index
    %1 = vector.load %arg2[%c0_1, %c0_2, %c0_3] : memref<1x48x128xf32, #tpu.memory_space<vmem>>, vector<1x48x128xf32>
    %2 = vector.shape_cast %1 : vector<1x48x128xf32> to vector<48x128xf32>
    %cst = arith.constant dense<0.000000e+00> : vector<96x128xf32>
    %3 = tpu.matmul %0, %2, %cst {dimension_numbers = #tpu.dot_dimension_numbers<[1], [0], [0], [1], [0, 0, 1, 1], [], []>} : vector<96x48xf32>, vector<48x128xf32>, vector<96x128xf32> -> vector<96x128xf32>
    %c0_4 = arith.constant 0 : index
    %c0_5 = arith.constant 0 : index
    %4 = vector.load %arg4[%c0_4, %c0_5] : memref<96x1xf32, #tpu.memory_space<vmem>>, vector<96x1xf32>
    %5 = vector.broadcast %4 : vector<96x1xf32> to vector<96x128xf32>
    %6 = arith.addf %3, %5 : vector<96x128xf32>
    %c0_6 = arith.constant 0 : index
    %c0_7 = arith.constant 0 : index
    %c0_8 = arith.constant 0 : index
    %7 = vector.load %arg5[%c0_6, %c0_7, %c0_8] : memref<1x96x128xf32, #tpu.memory_space<vmem>>, vector<1x96x128xf32>
    %8 = vector.shape_cast %7 : vector<1x96x128xf32> to vector<96x128xf32>
    %9 = vector.shape_cast %6 : vector<96x128xf32> to vector<1x96x128xf32>
    tpu.vector_store %arg5[%c0_6, %c0_7, %c0_8], %9 {strides = array<i32>} : memref<1x96x128xf32, #tpu.memory_space<vmem>>, vector<1x96x128xf32>,
    return
  }
  func.func @transform_0(%arg0: i32, %arg1: i32) -> (i32, i32, i32) {
    %c0_i32 = arith.constant 0 : i32
    %c0_i32_0 = arith.constant 0 : i32
    return %arg0, %c0_i32, %arg1 : i32, i32, i32
  }
  func.func @transform_1(%arg0: i32, %arg1: i32) -> (i32, i32) {
    %c0_i32 = arith.constant 0 : i32
    %c0_i32_0 = arith.constant 0 : i32
    %c0_i32_1 = arith.constant 0 : i32
    return %c0_i32, %c0_i32_0 : i32, i32
  }
  func.func @transform_2(%arg0: i32, %arg1: i32) -> (i32, i32) {
    %c0_i32 = arith.constant 0 : i32
    %c0_i32_0 = arith.constant 0 : i32
    %c0_i32_1 = arith.constant 0 : i32
    return %c0_i32, %c0_i32_0 : i32, i32
  }
  func.func @transform_3(%arg0: i32, %arg1: i32) -> (i32, i32, i32) {
    %c0_i32 = arith.constant 0 : i32
    %c0_i32_0 = arith.constant 0 : i32
    return %arg0, %c0_i32, %arg1 : i32, i32, i32
  }
}

</mosaic_0001>

<bundles_post_ra>
// kernel: conv2d_k4_s4.2
= control target key start
LH: loop header
LB: loop body
LE: loop exit
PB: predicated region body
PF: predicated region fallthrough
CT: control target
= control target key end

     0   :  { %s736_s17 = smov 0   ;;  %s738_s18 = smov 0   ;;  %s883_s0 = inlined_call_operand.vmem [shape: f32[96,48], index: 0, kind: input, shape index: {}]   ;;  %s884_s1 = inlined_call_operand.vmem [shape: f32[96,1], index: 1, kind: input, shape index: {}]   ;;  %s885_s2 = inlined_call_operand.vmem [shape: f32[2,48,16], index: 2, kind: input, shape index: {}]   ;;  %s886_s3 = inlined_call_operand.<no memory space> [shape: f32[], index: 3, kind: input, shape index: {}]   ;;  %s887_s4 = inlined_call_operand.vmem [shape: f32[2,96,128], index: 4, kind: output, shape index: {}]  }
   0x1   :  { %v734_v0 = vstv %s886_s3  ;;  %s740_s19 = smov 0  }
   0x2 LB: > { %s27_s3 = sadd.s32 1, %s699_s18  ;;  %p611_p0 = scmp.ge.s32.totalorder %s703_s19, 1  ;;  %s703_s19 = sphi %s740_s19, %s15_s19   ;;  %s699_s18 = sphi %s738_s18, %s889_s18   ;;  %s695_s17 = sphi %s736_s17, %s888_s17  }
   0x3   : > { %p29_p1 = scmp.ge.s32.totalorder %s27_s3, 2  ;;  %p162_p2 = scmp.lt.s32.totalorder %s703_s19, 3 }
   0x5   : > { %s891_s3 = smov (%p29_p1, %s27_s3), 0  ;;  %p163_p3 = pnand %p611_p0, %p162_p2 }
   0x6   : > { %p196_p4 = scmp.lt.s32.totalorder (!%p163_p3), %s695_s17, 1 }
   0x7   : > { %166 = sbr.rel (%p163_p3) target bundleno = 184 (0xb8), region = 32 }
   0xc   : > { %v352_v1 = vld [vmem:[%s884_s1 + $0x10] sm:$0xff]  ;;  %v350_v2 = vld [vmem:[%s884_s1] sm:$0xff]  ;;  %v223_v3 = vlaneseq  ;;  %v705_v4 = vmov 0   ;;  %s893_s17 = smov (!%p196_p4, %s695_s17), 1  ;;  %v353_v12 = vld [vmem:[%s884_s1 + $0x18] sm:$0xff]  ;;  %vm422_vm1 = vcmask 392192  }
   0xd   : > { %679 = vset.pattern.permute.xlu1 %v705_v4  ;;  %678 = vset.pattern.permute.xlu0 %v705_v4  ;;  %s651_s24 = smul.u32 48, %s893_s17  ;;  %v354_v6 = vld [vmem:[%s884_s1 + $0x20] sm:$0xff]  ;;  %v351_v13 = vld [vmem:[%s884_s1 + $0x8] sm:$0xff]  ;;  %v335_v22 = vld [vmem:[%s883_s0 + $0x18] sm:$0xff] }
   0xe   : > { %374 = vperm.xlu1 %679, %v352_v1   ;;  %364 = vperm.xlu0 %678, %v350_v2   ;;  %v224_v5 = vand.u32 127, %v223_v3  ;;  %v332_v21 = vld [vmem:[%s883_s0] sm:$0xff]  ;;  %v338_v23 = vld [vmem:[%s883_s0 + $0x30] sm:$0xff]  ;;  %v341_v24 = vld [vmem:[%s883_s0 + $0x48] sm:$0xff]  ;;  %s652_s26 = smul.u32 96, %s893_s17 }
   0xf   : > { %680 = vset.pattern.permute.xlu2 %v705_v4  ;;  %s203_s29 = scalar_lea.vmem %s885_s2, %s651_s24  ;;  %v357_v25 = vld [vmem:[%s884_s1 + $0x38] sm:$0xff]  ;;  %v356_v26 = vld [vmem:[%s884_s1 + $0x30] sm:$0xff]  ;;  %v355_v27 = vld [vmem:[%s884_s1 + $0x28] sm:$0xff] }
  0x10   : > { %vm227_vm0 = vcmp.lt.s32.totalorder %v224_v5, 16  ;;  %384 = vperm.xlu2 %680, %v354_v6   ;;  %v618_v7 = vld [vmem:[%s203_s29 + $0x28] sm:$0xff]  ;;  %v617_v8 = vld [vmem:[%s203_s29 + $0x20] sm:$0xff]  ;;  %v616_v11 = vld [vmem:[%s203_s29 + $0x18] sm:$0xff] }
  0x11   : > { %v327_v9 = vsel %vm227_vm0, %v618_v7, %v734_v0  ;;  %v307_v10 = vsel %vm227_vm0, %v617_v8, %v734_v0  ;;  %v615_v14 = vld [vmem:[%s203_s29 + $0x10] sm:$0xff]  ;;  %v287_v15 = vsel %vm227_vm0, %v616_v11, %v734_v0  ;;  %v614_v16 = vld [vmem:[%s203_s29 + $0x8] sm:$0xff]  ;;  %v217_v18 = vld [vmem:[%s203_s29] sm:$0xff]  ;;  %s860_s29 = scalar_lea.vmem %s887_s4, %s652_s26 }
  0x12   : > { %469 = vmatpush.msra.mxu0 %v327_v9  ;;  %633 = vmatpush.msra.mxu1 %v327_v9  ;;  %v267_v17 = vsel %vm227_vm0, %v615_v14, %v734_v0  ;;  %v247_v19 = vsel %vm227_vm0, %v614_v16, %v734_v0  ;;  %v228_v20 = vsel %vm227_vm0, %v217_v18, %v734_v0  ;;  %v333_v28 = vld [vmem:[%s883_s0 + $0x8] sm:$0xff]  ;;  %v336_v29 = vld [vmem:[%s883_s0 + $0x20] sm:$0xff]  ;;  %v339_v30 = vld [vmem:[%s883_s0 + $0x38] sm:$0xff] }
  0x13   : > { %634 = vmatpush.msra.mxu2 %v327_v9  ;;  %635 = vmatpush.msra.mxu3 %v327_v9  ;;  %v342_v31 = vld [vmem:[%s883_s0 + $0x50] sm:$0xff]  ;;  %v359_v33 = vld [vmem:[%s884_s1 + $0x48] sm:$0xff]  ;;  %v358_v34 = vld [vmem:[%s884_s1 + $0x40] sm:$0xff] }
  0x14   : > { %470 = vmatpush.msra.mxu0 %v307_v10  ;;  %636 = vmatpush.msra.mxu1 %v307_v10  ;;  %v360_v32 = vld [vmem:[%s884_s1 + $0x50] sm:$0xff]  ;;  %v337_v36 = vld [vmem:[%s883_s0 + $0x28] sm:$0xff]  ;;  %v340_v37 = vld [vmem:[%s883_s0 + $0x40] sm:$0xff] }
  0x15   : > { %637 = vmatpush.msra.mxu2 %v307_v10  ;;  %638 = vmatpush.msra.mxu3 %v307_v10  ;;  %v334_v35 = vld [vmem:[%s883_s0 + $0x10] sm:$0xff]  ;;  %v343_v38 = vld [vmem:[%s883_s0 + $0x58] sm:$0xff] }
  0x16   : > { %379 = vperm.xlu1 %679, %v353_v12   ;;  %369 = vperm.xlu0 %678, %v351_v13   ;;  %v361_v39 = vld [vmem:[%s884_s1 + $0x58] sm:$0xff] }
  0x17   : > { %471 = vmatpush.msra.mxu0 %v287_v15  ;;  %639 = vmatpush.msra.mxu1 %v287_v15 }
  0x18   : > { %640 = vmatpush.msra.mxu2 %v287_v15  ;;  %641 = vmatpush.msra.mxu3 %v287_v15 }
  0x19   : > { %472 = vmatpush.msra.mxu0 %v267_v17  ;;  %642 = vmatpush.msra.mxu1 %v267_v17 }
  0x1a   : > { %643 = vmatpush.msra.mxu2 %v267_v17  ;;  %644 = vmatpush.msra.mxu3 %v267_v17 }
  0x1b   : > { %473 = vmatpush.msra.mxu0 %v247_v19  ;;  %645 = vmatpush.msra.mxu1 %v247_v19 }
  0x1c   : > { %646 = vmatpush.msra.mxu2 %v247_v19  ;;  %647 = vmatpush.msra.mxu3 %v247_v19 }
  0x1d   : > { %474 = vmatpush.msra.mxu0 %v228_v20  ;;  %648 = vmatpush.msra.mxu1 %v228_v20 }
  0x1e   : > { %649 = vmatpush.msra.mxu2 %v228_v20  ;;  %650 = vmatpush.msra.mxu3 %v228_v20 }
  0x1f   : > { %619 = vmatmul.msk.f32.vlgmr.msra.gmra.mxu0 %vm422_vm1, %v332_v21  ;;  %622 = vmatmul.msk.f32.vlgmr.msra.gmra.mxu1 %vm422_vm1, %v335_v22 }
  0x20   : > { %625 = vmatmul.msk.f32.vlgmr.msra.gmra.mxu2 %vm422_vm1, %v338_v23  ;;  %628 = vmatmul.msk.f32.vlgmr.msra.gmra.mxu3 %vm422_vm1, %v341_v24 }
  0x21   : > { %399 = vperm.xlu1 %679, %v357_v25   ;;  %394 = vperm.xlu0 %678, %v356_v26  }
  0x22   : > { %389 = vperm.xlu2 %680, %v355_v27  }
  0x27   : > { %620 = vmatmul.msk.f32.gmra.mxu0 %vm422_vm1, %v333_v28  ;;  %623 = vmatmul.msk.f32.gmra.mxu1 %vm422_vm1, %v336_v29 }
  0x28   : > { %626 = vmatmul.msk.f32.gmra.mxu2 %vm422_vm1, %v339_v30  ;;  %629 = vmatmul.msk.f32.gmra.mxu3 %vm422_vm1, %v342_v31 }
  0x29   : > { %414 = vperm.xlu1 %679, %v360_v32   ;;  %409 = vperm.xlu0 %678, %v359_v33  }
  0x2a   : > { %404 = vperm.xlu2 %680, %v358_v34  }
  0x2f   : > { %621 = vmatmul.msk.f32.gmra.mxu0 %vm422_vm1, %v334_v35  ;;  %624 = vmatmul.msk.f32.gmra.mxu1 %vm422_vm1, %v337_v36 }
  0x30   : > { %627 = vmatmul.msk.f32.gmra.mxu2 %vm422_vm1, %v340_v37  ;;  %630 = vmatmul.msk.f32.gmra.mxu3 %vm422_vm1, %v343_v38 }
  0x32   : > { %419 = vperm.xlu2 %680, %v361_v39  }
  0x6a   : > { %v385_v43 = vpop.permute.xlu2 %384 }
  0x7c   : > { %v390_v50 = vpop.permute.xlu2 %389 }
  0x80   : > { %v365_v40 = vpop.permute.xlu0 %364  ;;  %v375_v41 = vpop.permute.xlu1 %374 }
  0x84   : > { %v405_v61 = vpop.permute.xlu2 %404 }
  0x88   : > { %v370_v42 = vpop.permute.xlu0 %369  ;;  %v380_v44 = vpop.permute.xlu1 %379 }
  0x8c   : > { %v420_v8 = vpop.permute.xlu2 %419 }
  0x93   : > { %v395_v45 = vpop.permute.xlu0 %394  ;;  %v400_v51 = vpop.permute.xlu1 %399 }
  0x9b   : > { %v410_v52 = vpop.permute.xlu0 %409  ;;  %v415_v62 = vpop.permute.xlu1 %414 }
  0x9c   : > { %v476_v46 = vpop.f32.mrf.mxu0  ;;  %v485_v47 = vpop.f32.mrf.mxu1 }
  0x9d   : > { %v477_v48 = vadd.f32 %v476_v46, %v365_v40  ;;  %v486_v49 = vadd.f32 %v485_v47, %v380_v44 }
  0x9f   : > { %512 = vst [vmem:[%s860_s29] sm:$0xff] %v477_v48 }
  0xa0   : > { %515 = vst [vmem:[%s860_s29 + $0x18] sm:$0xff] %v486_v49 }
  0xa3   : > { %v494_v53 = vpop.f32.mrf.mxu2  ;;  %v503_v54 = vpop.f32.mrf.mxu3 }
  0xa4   : > { %v495_v55 = vadd.f32 %v494_v53, %v395_v45  ;;  %v504_v56 = vadd.f32 %v503_v54, %v410_v52  ;;  %v479_v57 = vpop.f32.mrf.mxu0  ;;  %v488_v58 = vpop.f32.mrf.mxu1 }
  0xa5   : > { %v480_v59 = vadd.f32 %v479_v57, %v370_v42  ;;  %v489_v60 = vadd.f32 %v488_v58, %v385_v43 }
  0xa6   : > { %518 = vst [vmem:[%s860_s29 + $0x30] sm:$0xff] %v495_v55 }
  0xa7   : > { %521 = vst [vmem:[%s860_s29 + $0x48] sm:$0xff] %v504_v56 }
  0xa8   : > { %513 = vst [vmem:[%s860_s29 + $0x8] sm:$0xff] %v480_v59 }
  0xa9   : > { %516 = vst [vmem:[%s860_s29 + $0x20] sm:$0xff] %v489_v60 }
  0xab   : > { %v497_v63 = vpop.f32.mrf.mxu2  ;;  %v506_v1 = vpop.f32.mrf.mxu3 }
  0xac   : > { %v498_v2 = vadd.f32 %v497_v63, %v400_v51  ;;  %v507_v3 = vadd.f32 %v506_v1, %v415_v62  ;;  %v482_v4 = vpop.f32.mrf.mxu0  ;;  %v491_v5 = vpop.f32.mrf.mxu1 }
  0xad   : > { %v483_v6 = vadd.f32 %v482_v4, %v375_v41  ;;  %v492_v7 = vadd.f32 %v491_v5, %v390_v50 }
  0xae   : > { %519 = vst [vmem:[%s860_s29 + $0x38] sm:$0xff] %v498_v2 }
  0xaf   : > { %522 = vst [vmem:[%s860_s29 + $0x50] sm:$0xff] %v507_v3 }
  0xb0   : > { %514 = vst [vmem:[%s860_s29 + $0x10] sm:$0xff] %v483_v6 }
  0xb1   : > { %517 = vst [vmem:[%s860_s29 + $0x28] sm:$0xff] %v492_v7 }
  0xb3   : > { %v500_v9 = vpop.f32.mrf.mxu2  ;;  %v509_v10 = vpop.f32.mrf.mxu3 }
  0xb4   : > { %v501_v11 = vadd.f32 %v500_v9, %v405_v61  ;;  %v510_v12 = vadd.f32 %v509_v10, %v420_v8 }
  0xb6   : > { %520 = vst [vmem:[%s860_s29 + $0x40] sm:$0xff] %v501_v11 }
  0xb7   : > { %523 = vst [vmem:[%s860_s29 + $0x58] sm:$0xff] %v510_v12 }
  0xb8 PF: > { %s15_s19 = sadd.s32 1, %s703_s19   ;;  %s888_s17 = smov %s699_s18 }
  0xb9   : > { %p12_p5 = scmp.ge.s32.totalorder %s15_s19, 4   ;;  %s889_s18 = smov %s891_s3 }
  0xbb   :  { %14 = sbr.rel (!%p12_p5) target bundleno = 2 (0x2), region = 72 }

</bundles_post_ra>
